<compile_context>
chip_gen: v7x
topology: tpu7x:2x2x1
jax: 0.10.0
libtpu: 0.0.40
codegen_flags: <defaults>
</compile_context>

<pallas_src>
import jax
import jax.numpy as jnp
from jax.experimental import pallas as pl
from jax.experimental.pallas import tpu as pltpu

BN_EPS = 1e-5
OUT_PAD = 128   # lane-dense padded output width (true logit width is 2)


def net_kernel(x_ref, w1_ref, b1_ref, w2_ref, b2_ref, o_ref):
    # First linear (BatchNorm already folded into w1/b1 by the wrapper):
    #   [bt, num_mols] @ [num_mols, hidden] -> [bt, hidden]
    h = jnp.dot(x_ref[...], w1_ref[...], preferred_element_type=jnp.float32)
    # Folded bias (includes BN shift/scale) + ReLU.
    # TODO(synk): Dropout(p=0.5) is identity in eval mode; training-mode RNG
    # masking is not implemented here.
    h = jnp.maximum(h + b1_ref[...], 0.0)
    # Second linear against the zero-padded, lane-dense weight:
    #   [bt, hidden] @ [hidden, 128] -> [bt, 128]  (unmasked full-lane stores)
    o_ref[...] = (jnp.dot(h, w2_ref[...], preferred_element_type=jnp.float32)
                  + b2_ref[...]).astype(o_ref.dtype)


def _round_up(x, m):
    return (x + m - 1) // m * m


def net_forward(x, params, *, batch_tile=512):
    """Fused forward pass of Net. x: [B, num_mols] float32."""
    w1, b1, gamma, beta, mean, var, w2, b2 = params
    B, num_mols = x.shape
    hidden = w1.shape[1]

    # ---- one-time parameter folding (plain XLA, outside the kernel) --------
    scale = gamma * jax.lax.rsqrt(var + BN_EPS)              # [1, hidden]
    w1f = (w1 * scale).astype(jnp.float32)                   # [num_mols, hidden]
    b1f = ((b1 - mean) * scale + beta).astype(jnp.float32)   # [1, hidden]
    w2p = jnp.zeros((hidden, OUT_PAD), jnp.float32).at[:, :2].set(w2)
    b2p = jnp.zeros((1, OUT_PAD), jnp.float32).at[:, :2].set(b2)

    # ---- choose a VMEM-sized batch tile ------------------------------------
    # Double-buffered x tile + double-buffered padded output tile dominate;
    # keep them under ~24 MiB so this also fits v7x's smaller VMEM comfortably.
    bytes_per_row = 4 * (num_mols + OUT_PAD)
    vmem_budget = 24 * 1024 * 1024
    max_rows = max(8, (vmem_budget // (2 * bytes_per_row)) // 8 * 8)
    bt = max(8, min(batch_tile, max_rows, _round_up(B, 8)))
    bt = (bt // 8) * 8

    # ---- pad batch to a multiple of the tile (tail rows sliced off later) --
    B_pad = _round_up(B, bt)
    xp = x if B_pad == B else jnp.pad(x, ((0, B_pad - B), (0, 0)))

    grid = (B_pad // bt,)
    full2d = lambda shape: pl.BlockSpec(shape, lambda i: (0, 0))

    out = pl.pallas_call(
        net_kernel,
        out_shape=jax.ShapeDtypeStruct((B_pad, OUT_PAD), jnp.float32),
        grid_spec=pltpu.PrefetchScalarGridSpec(
            num_scalar_prefetch=0,
            grid=grid,
            in_specs=[
                pl.BlockSpec((bt, num_mols), lambda i: (i, 0)),  # x tile
                full2d((num_mols, hidden)),   # BN-folded w1
                full2d((1, hidden)),          # BN-folded b1
                full2d((hidden, OUT_PAD)),    # zero-padded w2
                full2d((1, OUT_PAD)),         # zero-padded b2
            ],
            out_specs=pl.BlockSpec((bt, OUT_PAD), lambda i: (i, 0)),
        ),
        compiler_params=pltpu.CompilerParams(
            dimension_semantics=("parallel",)),   # megacore-shardable batch
    )(xp, w1f, b1f, w2p, b2p)

    # Drop batch padding, keep the 2 real logit lanes, then PyTorch .squeeze().
    return jnp.squeeze(out[:B, :2])


def init_params(key, num_mols, hidden):
    """Deterministic parameter init mimicking the module's shapes."""
    k1, k2, k3, k4, k5, k6 = jax.random.split(key, 6)
    # Linear(num_mols, hidden): store transposed weight [num_mols, hidden]
    lim1 = 1.0 / jnp.sqrt(num_mols)
    w1 = jax.random.uniform(k1, (num_mols, hidden), jnp.float32, -lim1, lim1)
    b1 = jax.random.uniform(k2, (1, hidden), jnp.float32, -lim1, lim1)
    # BatchNorm1d(hidden): affine params + running stats
    gamma = 1.0 + 0.1 * jax.random.normal(k3, (1, hidden), jnp.float32)
    beta = 0.1 * jax.random.normal(k4, (1, hidden), jnp.float32)
    mean = jnp.zeros((1, hidden), jnp.float32)       # running_mean init
    var = jnp.ones((1, hidden), jnp.float32)         # running_var init
    # Linear(hidden, 2): store transposed weight [hidden, 2]
    lim2 = 1.0 / jnp.sqrt(hidden)
    w2 = jax.random.uniform(k5, (hidden, 2), jnp.float32, -lim2, lim2)
    b2 = jax.random.uniform(k6, (1, 2), jnp.float32, -lim2, lim2)
    return (w1, b1, gamma, beta, mean, var, w2, b2)


def reference_forward(x, params):
    """Plain-JAX reference for correctness check (eval-mode semantics)."""
    w1, b1, gamma, beta, mean, var, w2, b2 = params
    h = x @ w1 + b1
    h = (h - mean) * gamma * jax.lax.rsqrt(var + BN_EPS) + beta
    h = jnp.maximum(h, 0.0)
    return jnp.squeeze(h @ w2 + b2)


if __name__ == "__main__":
    num_mols, hidden, batch = 32, 64, 8

    key = jax.random.PRNGKey(0)
    kx, kp = jax.random.split(key)
    x = jax.random.normal(kx, (batch, num_mols), jnp.float32)
    params = init_params(kp, num_mols, hidden)

    out = net_forward(x, params)
    out = jax.block_until_ready(out)

    ref = reference_forward(x, params)
    assert out.shape == (batch, 2), out.shape
    assert jnp.allclose(out, ref, atol=1e-5, rtol=1e-5), (
        f"max abs err {jnp.max(jnp.abs(out - ref))}")

    print("KERNEL_OK")
</pallas_src>

<mosaic_0001>
module attributes {stable_mosaic.version = 11 : i64} {
  func.func @net_kernel(%arg0: i32, %arg1: memref<8x32xf32, #tpu.memory_space<vmem>>, %arg2: memref<32x64xf32, #tpu.memory_space<vmem>>, %arg3: memref<1x64xf32, #tpu.memory_space<vmem>>, %arg4: memref<64x128xf32, #tpu.memory_space<vmem>>, %arg5: memref<1x128xf32, #tpu.memory_space<vmem>>, %arg6: memref<8x128xf32, #tpu.memory_space<vmem>>) attributes {dimension_semantics = [#tpu.dimension_semantics<parallel>], iteration_bounds = array<i64: 1>, scalar_prefetch = 0 : i64, scratch_operands = 0 : i64, tpu.core_type = #tpu.core_type<tc>, window_params = [{transform_indices = @transform_0, window_bounds = array<i64: 8, 32>}, {pipeline_mode = #tpu.pipeline_mode<synchronous>, transform_indices = @transform_1, window_bounds = array<i64: 32, 64>}, {pipeline_mode = #tpu.pipeline_mode<synchronous>, transform_indices = @transform_2, window_bounds = array<i64: 1, 64>}, {pipeline_mode = #tpu.pipeline_mode<synchronous>, transform_indices = @transform_3, window_bounds = array<i64: 64, 128>}, {pipeline_mode = #tpu.pipeline_mode<synchronous>, transform_indices = @transform_4, window_bounds = array<i64: 1, 128>}, {transform_indices = @transform_5, window_bounds = array<i64: 8, 128>}]} {
    %c0 = arith.constant 0 : index
    %c0_0 = arith.constant 0 : index
    %0 = vector.load %arg1[%c0, %c0_0] : memref<8x32xf32, #tpu.memory_space<vmem>>, vector<8x32xf32>
    %c0_1 = arith.constant 0 : index
    %c0_2 = arith.constant 0 : index
    %1 = vector.load %arg2[%c0_1, %c0_2] : memref<32x64xf32, #tpu.memory_space<vmem>>, vector<32x64xf32>
    %cst = arith.constant dense<0.000000e+00> : vector<8x64xf32>
    %2 = tpu.matmul %0, %1, %cst {dimension_numbers = #tpu.dot_dimension_numbers<[1], [0], [0], [1], [0, 0, 1, 1], [], []>} : vector<8x32xf32>, vector<32x64xf32>, vector<8x64xf32> -> vector<8x64xf32>
    %c0_3 = arith.constant 0 : index
    %c0_4 = arith.constant 0 : index
    %3 = vector.load %arg3[%c0_3, %c0_4] : memref<1x64xf32, #tpu.memory_space<vmem>>, vector<1x64xf32>
    %4 = vector.broadcast %3 : vector<1x64xf32> to vector<8x64xf32>
    %5 = arith.addf %2, %4 : vector<8x64xf32>
    %cst_5 = arith.constant 0.000000e+00 : f32
    %6 = vector.broadcast %cst_5 : f32 to vector<8x64xf32>
    %7 = arith.maximumf %5, %6 : vector<8x64xf32>
    %c0_6 = arith.constant 0 : index
    %c0_7 = arith.constant 0 : index
    %8 = vector.load %arg4[%c0_6, %c0_7] : memref<64x128xf32, #tpu.memory_space<vmem>>, vector<64x128xf32>
    %cst_8 = arith.constant dense<0.000000e+00> : vector<8x128xf32>
    %9 = tpu.matmul %7, %8, %cst_8 {dimension_numbers = #tpu.dot_dimension_numbers<[1], [0], [0], [1], [0, 0, 1, 1], [], []>} : vector<8x64xf32>, vector<64x128xf32>, vector<8x128xf32> -> vector<8x128xf32>
    %c0_9 = arith.constant 0 : index
    %c0_10 = arith.constant 0 : index
    %10 = vector.load %arg5[%c0_9, %c0_10] : memref<1x128xf32, #tpu.memory_space<vmem>>, vector<1x128xf32>
    %11 = vector.broadcast %10 : vector<1x128xf32> to vector<8x128xf32>
    %12 = arith.addf %9, %11 : vector<8x128xf32>
    %c0_11 = arith.constant 0 : index
    %c0_12 = arith.constant 0 : index
    %13 = vector.load %arg6[%c0_11, %c0_12] : memref<8x128xf32, #tpu.memory_space<vmem>>, vector<8x128xf32>
    tpu.vector_store %arg6[%c0_11, %c0_12], %12 {strides = array<i32>} : memref<8x128xf32, #tpu.memory_space<vmem>>, vector<8x128xf32>,
    return
  }
  func.func @transform_0(%arg0: i32) -> (i32, i32) {
    %c0_i32 = arith.constant 0 : i32
    %c0_i32_0 = arith.constant 0 : i32
    return %arg0, %c0_i32 : i32, i32
  }
  func.func @transform_1(%arg0: i32) -> (i32, i32) {
    %c0_i32 = arith.constant 0 : i32
    %c0_i32_0 = arith.constant 0 : i32
    %c0_i32_1 = arith.constant 0 : i32
    return %c0_i32, %c0_i32_0 : i32, i32
  }
  func.func @transform_2(%arg0: i32) -> (i32, i32) {
    %c0_i32 = arith.constant 0 : i32
    %c0_i32_0 = arith.constant 0 : i32
    %c0_i32_1 = arith.constant 0 : i32
    return %c0_i32, %c0_i32_0 : i32, i32
  }
  func.func @transform_3(%arg0: i32) -> (i32, i32) {
    %c0_i32 = arith.constant 0 : i32
    %c0_i32_0 = arith.constant 0 : i32
    %c0_i32_1 = arith.constant 0 : i32
    return %c0_i32, %c0_i32_0 : i32, i32
  }
  func.func @transform_4(%arg0: i32) -> (i32, i32) {
    %c0_i32 = arith.constant 0 : i32
    %c0_i32_0 = arith.constant 0 : i32
    %c0_i32_1 = arith.constant 0 : i32
    return %c0_i32, %c0_i32_0 : i32, i32
  }
  func.func @transform_5(%arg0: i32) -> (i32, i32) {
    %c0_i32 = arith.constant 0 : i32
    %c0_i32_0 = arith.constant 0 : i32
    return %arg0, %c0_i32 : i32, i32
  }
}

</mosaic_0001>

<bundles_post_ra>
// kernel: tpu_custom_call.1
= control target key start
LH: loop header
LB: loop body
LE: loop exit
PB: predicated region body
PF: predicated region fallthrough
CT: control target
= control target key end

     0   :  { %10 = vsyncpa [#allocation3], 0  ;;  %s521_s0 = inlined_call_operand.hbm [shape: f32[8,32], index: 0, kind: input, shape index: {}]   ;;  %s522_s1 = inlined_call_operand.hbm [shape: f32[32,64], index: 1, kind: input, shape index: {}]   ;;  %s523_s2 = inlined_call_operand.vmem [shape: f32[1,64], index: 2, kind: input, shape index: {}]   ;;  %s524_s3 = inlined_call_operand.hbm [shape: f32[64,128], index: 3, kind: input, shape index: {}]   ;;  %s525_s4 = inlined_call_operand.vmem [shape: f32[1,128], index: 4, kind: input, shape index: {}]   ;;  %s526_s5 = inlined_call_operand.hbm [shape: f32[8,128], index: 5, kind: output, shape index: {}]  }
   0x1   :  { %11 = vsyncpa [#allocation6], 0 }
   0x2   :  { %12 = vsyncpa [#allocation4], 0  ;;  %s422_s18 = smov [#allocation5]   ;;  %s328_s22 = scalar_lea.hbm %s522_s1, 512 }
   0x3   :  { %s28_s19 = sshll.u32 %s422_s18, 4  ;;  %p329_p0 = scmp.ne.s32.totalorder %s522_s1, %s328_s22  ;;  %s29_s19 = int_to_ptr.vmem [resolvable:$true] %s28_s19 }
   0x4   :  { %p332_p1 = scmp.lt.u32.totalorder %s328_s22, %s522_s1 }
   0x6   :  { %p334_p2 = pnand %p332_p1, %p329_p0 }
   0x8   :  { %337 = shalt.err (!%p334_p2)
}
   0x9   :  { %s338_s27 = scalar_lea.vmem %s29_s19, 512  ;;  %p343_p4 = scmp.lt.s32.totalorder %s29_s19, %s29_s19 }
   0xa   :  { %p339_p3 = scmp.ne.s32.totalorder %s29_s19, %s338_s27  ;;  %p344_p5 = scmp.lt.s32.totalorder %s338_s27, %s338_s27 }
   0xc   :  { %p345_p6 = por %p344_p5, %p343_p4 }
   0xe   :  { %p346_p7 = pnand %p345_p6, %p339_p3 }
  0x10   :  { %349 = shalt.err (!%p346_p7)
}
  0x11   :  { %s423_s28 = smov 128   ;;  %s424_s29 = smov 8  }
  0x12   :  { %34 = dma.hbm_to_vmem [thread:$0]  %s522_s1, 512, %s29_s19, [#allocation6], %s423_s28, %s423_s28, %s424_s29  }
  0x13   :  { %s425_s7 = smov [#allocation2]   ;;  %s426_s9 = smov [#allocation7]  }
  0x14   :  { %s19_s8 = sshll.u32 %s425_s7, 4  ;;  %s42_s10 = sshll.u32 %s426_s9, 4  ;;  %s20_s8 = int_to_ptr.vmem [resolvable:$true] %s19_s8  ;;  %s43_s10 = int_to_ptr.vmem [resolvable:$true] %s42_s10 }
  0x15   :  { %s350_s13 = scalar_lea.hbm %s521_s0, 128 }
  0x16   :  { %p351_p8 = scmp.ne.s32.totalorder %s521_s0, %s350_s13  ;;  %p354_p9 = scmp.lt.u32.totalorder %s350_s13, %s521_s0 }
  0x18   :  { %p356_p10 = pnand %p354_p9, %p351_p8 }
  0x1a   :  { %359 = shalt.err (!%p356_p10)
}
  0x1b   :  { %s360_s1 = scalar_lea.vmem %s20_s8, 128  ;;  %p365_p12 = scmp.lt.s32.totalorder %s20_s8, %s20_s8 }
  0x1c   :  { %p361_p11 = scmp.ne.s32.totalorder %s20_s8, %s360_s1  ;;  %p366_p13 = scmp.lt.s32.totalorder %s360_s1, %s360_s1 }
  0x1e   :  { %p367_p0 = por %p366_p13, %p365_p12 }
  0x20   :  { %p368_p1 = pnand %p367_p0, %p361_p11 }
  0x22   :  { %371 = shalt.err (!%p368_p1)
}
  0x23   :  { %22 = dma.hbm_to_vmem [thread:$0]  %s521_s0, 128, %s20_s8, [#allocation3]  }
  0x24   :  { %s372_s22 = scalar_lea.hbm %s524_s3, 1024 }
  0x25   :  { %p373_p2 = scmp.ne.s32.totalorder %s524_s3, %s372_s22  ;;  %p376_p3 = scmp.lt.u32.totalorder %s372_s22, %s524_s3 }
  0x27   :  { %p378_p4 = pnand %p376_p3, %p373_p2 }
  0x29   :  { %381 = shalt.err (!%p378_p4)
}
  0x2a   :  { %s382_s27 = scalar_lea.vmem %s43_s10, 1024  ;;  %p387_p6 = scmp.lt.s32.totalorder %s43_s10, %s43_s10 }
  0x2b   :  { %p383_p5 = scmp.ne.s32.totalorder %s43_s10, %s382_s27  ;;  %p388_p7 = scmp.lt.s32.totalorder %s382_s27, %s382_s27 }
  0x2d   :  { %p389_p8 = por %p388_p7, %p387_p6 }
  0x2f   :  { %p390_p9 = pnand %p389_p8, %p383_p5 }
  0x31   :  { %393 = shalt.err (!%p390_p9)
}
  0x32   :  { %48 = dma.hbm_to_vmem [thread:$0]  %s524_s3, 1024, %s43_s10, [#allocation6], %s423_s28, %s423_s28, %s424_s29  }
  0x33   :  { %416 = dma.done.wait [#allocation3], 128  }
  0x34   :  { %417 = vsyncadd [#allocation3], 4294967168 }
  0x35   :  { %418 = dma.done.wait [#allocation6], 1536  }
  0x36   :  { %419 = vsyncadd [#allocation6], 4294965760  ;;  %v427_v0 = vmov 0.0|0.0   ;;  %vm428_vm0 = vmmov 0   ;;  %v429_v1 = vmov 0.0   ;;  %v61_v2 = vld [vmem:[#allocation5] sm:$0xff] }
  0x37   :  { %301 = vmatprep.subr.bf16.mxu0 %v427_v0  ;;  %279 = vmatprep.mubr.msk.f32.mxu0 %vm428_vm0, %v429_v1  ;;  %v62_v3 = vld [vmem:[#allocation5 + $0x8] sm:$0xff]  ;;  %v63_v4 = vld [vmem:[#allocation5 + $0x10] sm:$0xff]  ;;  %v64_v6 = vld [vmem:[#allocation5 + $0x18] sm:$0xff]  ;;  %vm72_vm1 = vcmask 261120   ;;  %vm162_vm2 = vcmask 523264   ;;  %s430_s7 = smov [#allocation8]  }
  0x38   :  { %307 = vmatprep.subr.bf16.mxu1 %v427_v0  ;;  %298 = vmatprep.mubr.msk.f32.mxu1 %vm428_vm0, %v429_v1  ;;  %v302_v5 = vpack.c.bf16 %v62_v3, %v61_v2  ;;  %v147_v7 = vld [vmem:[#allocation7] sm:$0xff]  ;;  %v148_v8 = vld [vmem:[#allocation7 + $0x8] sm:$0xff]  ;;  %v149_v9 = vld [vmem:[#allocation7 + $0x10] sm:$0xff]  ;;  %v305_v11 = vpack.c.bf16 %v64_v6, %v63_v4  ;;  %s243_s8 = sshll.u32 %s430_s7, 4  ;;  %s244_s8 = int_to_ptr.vmem [resolvable:$true] %s243_s8 }
  0x39   :  { %v150_v10 = vld [vmem:[#allocation7 + $0x18] sm:$0xff]  ;;  %v308_v12 = vpack.c.bf16 %v148_v8, %v147_v7  ;;  %v151_v14 = vld [vmem:[#allocation7 + $0x20] sm:$0xff]  ;;  %v152_v15 = vld [vmem:[#allocation7 + $0x28] sm:$0xff]  ;;  %s394_s9 = scalar_lea.vmem %s244_s8, 128  ;;  %p399_p11 = scmp.lt.s32.totalorder %s244_s8, %s244_s8 }
  0x3a   :  { %303 = vmatpush3.bf16.msra.mxu0 %v302_v5  ;;  %v311_v13 = vpack.c.bf16 %v150_v10, %v149_v9  ;;  %v60_v16 = vld [vmem:[#allocation2] sm:$0xff]  ;;  %v314_v17 = vpack.c.bf16 %v152_v15, %v151_v14  ;;  %v153_v18 = vld [vmem:[#allocation7 + $0x30] sm:$0xff]  ;;  %p395_p10 = scmp.ne.s32.totalorder %s244_s8, %s394_s9  ;;  %p400_p12 = scmp.lt.s32.totalorder %s394_s9, %s394_s9 }
  0x3b   :  { %304 = vmatprep.subr.bf16.mxu0 %v427_v0  ;;  %309 = vmatpush3.bf16.msra.mxu1 %v308_v12  ;;  %v154_v19 = vld [vmem:[#allocation7 + $0x38] sm:$0xff] }
  0x3c   :  { %310 = vmatprep.subr.bf16.mxu1 %v427_v0  ;;  %v317_v20 = vpack.c.bf16 %v154_v19, %v153_v18  ;;  %v253_v21 = vld [vmem:[%s523_s2] ss:$0 sm:$0xff]  ;;  %p401_p13 = por %p400_p12, %p399_p11 }
  0x3d   :  { %v255_v26 = vld [vmem:[%s525_s4] ss:$0 sm:$0xff] }
  0x3e   :  { %306 = vmatpush3.bf16.msra.mxu0 %v305_v11  ;;  %p402_p0 = pnand %p401_p13, %p395_p10 }
  0x3f   :  { %312 = vmatpush3.bf16.msra.mxu1 %v311_v13 }
  0x40   :  { %313 = vmatprep.subr.bf16.mxu1 %v427_v0 }
  0x41   :  { %280 = vmatmul.mubr.msk.f32.vlgmr.msra.gmra.mrb[0].mxu0 %vm72_vm1, %v60_v16 }
  0x43   :  { %315 = vmatpush3.bf16.msra.mxu1 %v314_v17 }
  0x44   :  { %316 = vmatprep.subr.bf16.mxu1 %v427_v0 }
  0x47   :  { %318 = vmatpush3.bf16.msra.mxu1 %v317_v20 }
 0x114   :  { %v142_v22 = vpop.f32.mrb[0].mxu0 }
 0x115   :  { %v143_v23 = vadd.f32 %v253_v21, %v142_v22  ;;  %v281_v24 = vpop.f32.mrb[1].mxu0 }
 0x117   :  { %v146_v25 = vmax.f32 %v143_v23, 0.0 }
 0x119   :  { %299 = vmatmul.mubr.msk.f32.vlgmr.msra.gmra.mrb[0].mxu1 %vm162_vm2, %v146_v25 }
 0x1ec   :  { %v232_v27 = vpop.f32.mrb[0].mxu1 }
 0x1ed   :  { %v233_v28 = vadd.f32 %v255_v26, %v232_v27  ;;  %v300_v29 = vpop.f32.mrb[1].mxu1 }
 0x1ef   :  { %236 = vst [vmem:[#allocation8] sm:$0xff] %v233_v28 }
 0x1f0   :  { %405 = shalt.err (!%p402_p0)
}
 0x1f1   :  { %s406_s11 = scalar_lea.hbm %s526_s5, 128 }
 0x1f2   :  { %p407_p1 = scmp.ne.s32.totalorder %s526_s5, %s406_s11  ;;  %p410_p2 = scmp.lt.u32.totalorder %s406_s11, %s526_s5 }
 0x1f4   :  { %p412_p3 = pnand %p410_p2, %p407_p1 }
 0x1f6   :  { %415 = shalt.err (!%p412_p3)
}
 0x1f7   :  { %246 = dma.vmem_to_hbm [thread:$0]  %s244_s8, 128, %s526_s5, [#allocation4]  }
 0x1f8   :  { %420 = dma.done.wait [#allocation4], 128  }
 0x1f9   :  { %421 = vsyncadd [#allocation4], 4294967168 }
 0x1fa   :  { %250 = vsyncpa [#allocation3], 1 }
 0x1fb   :  { %251 = vsyncpa [#allocation6], 1 }
 0x1fc   :  { %252 = vsyncpa [#allocation4], 1 }

</bundles_post_ra>
